<compile_context>
chip_gen: v7x
topology: tpu7x:2x2x1
jax: 0.10.0
libtpu: 0.0.40
codegen_flags: <defaults>
</compile_context>

<pallas_src>
import functools

import jax
import jax.numpy as jnp
from jax import lax
from jax.experimental import pallas as pl
from jax.experimental.pallas import tpu as pltpu


# -----------------------------------------------------------------------------
# Fused kernel: qkv linear -> per-head attention -> output linear (+ bias)
# -----------------------------------------------------------------------------
def _fused_attention_kernel(x_ref, wqkv_ref, wproj_ref, bproj_ref, o_ref, *,
                            num_heads, head_dim, scale):
    N = x_ref.shape[1]
    C = x_ref.shape[2]
    D = head_dim

    x = x_ref[0].astype(jnp.bfloat16)              # (N, C)
    w_qkv = wqkv_ref[...].astype(jnp.bfloat16)     # (C, 3C)
    w_proj = wproj_ref[...].astype(jnp.bfloat16)   # (C, C)

    # qkv projection, f32 accumulation on the MXU; stays resident in VMEM.
    qkv = jnp.dot(x, w_qkv, preferred_element_type=jnp.float32)   # (N, 3C) f32

    # Output accumulator, initialized with the projection bias (broadcasts).
    #   concat_h(o_h) @ W_proj  ==  sum_h  o_h @ W_proj[h*D:(h+1)*D, :]
    y = bproj_ref[...].astype(jnp.float32)         # (1, C)

    for h in range(num_heads):
        q = (qkv[:, h * D:(h + 1) * D] * scale).astype(jnp.bfloat16)        # (N, D)
        k = qkv[:, C + h * D:C + (h + 1) * D].astype(jnp.bfloat16)          # (N, D)
        v = qkv[:, 2 * C + h * D:2 * C + (h + 1) * D].astype(jnp.bfloat16)  # (N, D)

        # scores = q @ k^T without an explicit transpose of k.
        s = lax.dot_general(q, k, (((1,), (1,)), ((), ())),
                            preferred_element_type=jnp.float32)             # (N, N)

        # softmax in f32 (max-subtracted), denominator via approx reciprocal.
        m = jnp.max(s, axis=-1, keepdims=True)
        p = jnp.exp(s - m)
        p = p * pl.reciprocal(jnp.sum(p, axis=-1, keepdims=True), approx=True)
        # attn_drop: identity in eval mode.

        o_h = jnp.dot(p.astype(jnp.bfloat16), v,
                      preferred_element_type=jnp.float32)                   # (N, D)
        y = y + jnp.dot(o_h.astype(jnp.bfloat16),
                        w_proj[h * D:(h + 1) * D, :],
                        preferred_element_type=jnp.float32)                 # (N, C)

    # proj_drop: identity in eval mode. Single lane-dense (N, C) store.
    o_ref[0] = y.astype(o_ref.dtype)


# -----------------------------------------------------------------------------
# Full module forward (one pallas_call)
# -----------------------------------------------------------------------------
def attention_forward(x, params, num_heads):
    """x: (B, N, C). params: 'w_qkv' (C, 3C), 'w_proj' (C, C), 'b_proj' (1, C).
    Weights are stored pre-transposed as (in_features, out_features)."""
    B, N, C = x.shape
    head_dim = C // num_heads
    scale = head_dim ** (-0.5)

    kernel = functools.partial(
        _fused_attention_kernel,
        num_heads=num_heads, head_dim=head_dim, scale=scale)

    return pl.pallas_call(
        kernel,
        out_shape=jax.ShapeDtypeStruct((B, N, C), x.dtype),
        grid=(B,),
        in_specs=[
            pl.BlockSpec((1, N, C), lambda b: (b, 0, 0)),      # x: per-batch tile
            pl.BlockSpec((C, 3 * C), lambda b: (0, 0)),        # w_qkv: resident
            pl.BlockSpec((C, C), lambda b: (0, 0)),            # w_proj: resident
            pl.BlockSpec((1, C), lambda b: (0, 0)),            # b_proj: resident
        ],
        out_specs=pl.BlockSpec((1, N, C), lambda b: (b, 0, 0)),
        compiler_params=pltpu.CompilerParams(
            dimension_semantics=("parallel",)),
    )(x, params["w_qkv"], params["w_proj"], params["b_proj"])


# -----------------------------------------------------------------------------
# Pure-JAX reference (f32) for sanity checking
# -----------------------------------------------------------------------------
def attention_reference(x, params, num_heads):
    B, N, C = x.shape
    D = C // num_heads
    scale = D ** (-0.5)
    qkv = x @ params["w_qkv"]
    qkv = qkv.reshape(B, N, 3, num_heads, D).transpose(2, 0, 3, 1, 4)
    q, k, v = qkv[0], qkv[1], qkv[2]
    attn = jnp.einsum("bhnd,bhmd->bhnm", q, k) * scale
    attn = jax.nn.softmax(attn, axis=-1)
    o = jnp.einsum("bhnm,bhmd->bhnd", attn, v)
    o = o.transpose(0, 2, 1, 3).reshape(B, N, C)
    return o @ params["w_proj"] + params["b_proj"][0]


if __name__ == "__main__":
    # Small shapes consistent with the module: dim=32, num_heads=4, seq=8, batch=2
    B, N, C = 2, 8, 32
    num_heads = 4

    key = jax.random.PRNGKey(0)
    kx, kq, kp, kb = jax.random.split(key, 4)

    x = jax.random.normal(kx, (B, N, C), dtype=jnp.float32)
    params = {
        # stored as (in_features, out_features), i.e. PyTorch weight transposed
        "w_qkv": jax.random.normal(kq, (C, 3 * C), dtype=jnp.float32) * 0.05,
        "w_proj": jax.random.normal(kp, (C, C), dtype=jnp.float32) * 0.05,
        "b_proj": jax.random.normal(kb, (1, C), dtype=jnp.float32) * 0.05,
    }

    out = attention_forward(x, params, num_heads)
    out = jax.block_until_ready(out)

    ref = attention_reference(x, params, num_heads)
    assert out.shape == (B, N, C)
    # bf16 MXU operands + approx reciprocal -> loosened tolerance vs f32 ref.
    assert jnp.allclose(out, ref, atol=2e-2, rtol=2e-2), "mismatch vs reference"

    print("KERNEL_OK")
</pallas_src>

<mosaic_0001>
module attributes {stable_mosaic.version = 11 : i64} {
  func.func @_fused_attention_kernel(%arg0: i32, %arg1: memref<1x8x32xf32, #tpu.memory_space<vmem>>, %arg2: memref<32x96xf32, #tpu.memory_space<vmem>>, %arg3: memref<32x32xf32, #tpu.memory_space<vmem>>, %arg4: memref<1x32xf32, #tpu.memory_space<vmem>>, %arg5: memref<1x8x32xf32, #tpu.memory_space<vmem>>) attributes {dimension_semantics = [#tpu.dimension_semantics<parallel>], iteration_bounds = array<i64: 2>, scalar_prefetch = 0 : i64, scratch_operands = 0 : i64, tpu.core_type = #tpu.core_type<tc>, window_params = [{transform_indices = @transform_0, window_bounds = array<i64: 1, 8, 32>}, {pipeline_mode = #tpu.pipeline_mode<synchronous>, transform_indices = @transform_1, window_bounds = array<i64: 32, 96>}, {pipeline_mode = #tpu.pipeline_mode<synchronous>, transform_indices = @transform_2, window_bounds = array<i64: 32, 32>}, {pipeline_mode = #tpu.pipeline_mode<synchronous>, transform_indices = @transform_3, window_bounds = array<i64: 1, 32>}, {transform_indices = @transform_4, window_bounds = array<i64: 1, 8, 32>}]} {
    %c0 = arith.constant 0 : index
    %c0_0 = arith.constant 0 : index
    %c0_1 = arith.constant 0 : index
    %0 = vector.load %arg1[%c0, %c0_0, %c0_1] : memref<1x8x32xf32, #tpu.memory_space<vmem>>, vector<1x8x32xf32>
    %1 = vector.shape_cast %0 : vector<1x8x32xf32> to vector<8x32xf32>
    %2 = arith.truncf %1 : vector<8x32xf32> to vector<8x32xbf16>
    %c0_2 = arith.constant 0 : index
    %c0_3 = arith.constant 0 : index
    %3 = vector.load %arg2[%c0_2, %c0_3] : memref<32x96xf32, #tpu.memory_space<vmem>>, vector<32x96xf32>
    %4 = arith.truncf %3 : vector<32x96xf32> to vector<32x96xbf16>
    %c0_4 = arith.constant 0 : index
    %c0_5 = arith.constant 0 : index
    %5 = vector.load %arg3[%c0_4, %c0_5] : memref<32x32xf32, #tpu.memory_space<vmem>>, vector<32x32xf32>
    %6 = arith.truncf %5 : vector<32x32xf32> to vector<32x32xbf16>
    %cst = arith.constant dense<0.000000e+00> : vector<8x96xf32>
    %7 = tpu.matmul %2, %4, %cst {dimension_numbers = #tpu.dot_dimension_numbers<[1], [0], [0], [1], [0, 0, 1, 1], [], []>} : vector<8x32xbf16>, vector<32x96xbf16>, vector<8x96xf32> -> vector<8x96xf32>
    %c0_6 = arith.constant 0 : index
    %c0_7 = arith.constant 0 : index
    %8 = vector.load %arg4[%c0_6, %c0_7] : memref<1x32xf32, #tpu.memory_space<vmem>>, vector<1x32xf32>
    %9 = vector.extract_strided_slice %7 {offsets = [0, 0], sizes = [8, 8], strides = [1, 1]} : vector<8x96xf32> to vector<8x8xf32>
    %cst_8 = arith.constant 0.353553385 : f32
    %10 = vector.broadcast %cst_8 : f32 to vector<8x8xf32>
    %11 = arith.mulf %9, %10 : vector<8x8xf32>
    %12 = arith.truncf %11 : vector<8x8xf32> to vector<8x8xbf16>
    %13 = vector.extract_strided_slice %7 {offsets = [0, 32], sizes = [8, 8], strides = [1, 1]} : vector<8x96xf32> to vector<8x8xf32>
    %14 = arith.truncf %13 : vector<8x8xf32> to vector<8x8xbf16>
    %15 = vector.extract_strided_slice %7 {offsets = [0, 64], sizes = [8, 8], strides = [1, 1]} : vector<8x96xf32> to vector<8x8xf32>
    %16 = arith.truncf %15 : vector<8x8xf32> to vector<8x8xbf16>
    %cst_9 = arith.constant dense<0.000000e+00> : vector<8x8xf32>
    %17 = tpu.matmul %12, %14, %cst_9 {dimension_numbers = #tpu.dot_dimension_numbers<[1], [1], [0], [0], [0, 0, 1, 0], [], []>} : vector<8x8xbf16>, vector<8x8xbf16>, vector<8x8xf32> -> vector<8x8xf32>
    %cst_10 = arith.constant dense<0xFF800000> : vector<8xf32>
    %18 = vector.multi_reduction <maximumf>, %17, %cst_10 [1] : vector<8x8xf32> to vector<8xf32>
    %19 = vector.shape_cast %18 : vector<8xf32> to vector<8x1xf32>
    %20 = vector.broadcast %19 : vector<8x1xf32> to vector<8x8xf32>
    %21 = arith.subf %17, %20 : vector<8x8xf32>
    %22 = math.exp %21 : vector<8x8xf32>
    %cst_11 = arith.constant dense<0.000000e+00> : vector<8xf32>
    %23 = vector.multi_reduction <add>, %22, %cst_11 [1] : vector<8x8xf32> to vector<8xf32>
    %24 = vector.shape_cast %23 : vector<8xf32> to vector<8x1xf32>
    %25 = tpu.reciprocal %24 {approx = true} : vector<8x1xf32> -> vector<8x1xf32>
    %26 = vector.broadcast %25 : vector<8x1xf32> to vector<8x8xf32>
    %27 = arith.mulf %22, %26 : vector<8x8xf32>
    %28 = arith.truncf %27 : vector<8x8xf32> to vector<8x8xbf16>
    %cst_12 = arith.constant dense<0.000000e+00> : vector<8x8xf32>
    %29 = tpu.matmul %28, %16, %cst_12 {dimension_numbers = #tpu.dot_dimension_numbers<[1], [0], [0], [1], [0, 0, 1, 1], [], []>} : vector<8x8xbf16>, vector<8x8xbf16>, vector<8x8xf32> -> vector<8x8xf32>
    %30 = arith.truncf %29 : vector<8x8xf32> to vector<8x8xbf16>
    %31 = vector.extract_strided_slice %6 {offsets = [0, 0], sizes = [8, 32], strides = [1, 1]} : vector<32x32xbf16> to vector<8x32xbf16>
    %cst_13 = arith.constant dense<0.000000e+00> : vector<8x32xf32>
    %32 = tpu.matmul %30, %31, %cst_13 {dimension_numbers = #tpu.dot_dimension_numbers<[1], [0], [0], [1], [0, 0, 1, 1], [], []>} : vector<8x8xbf16>, vector<8x32xbf16>, vector<8x32xf32> -> vector<8x32xf32>
    %33 = vector.broadcast %8 : vector<1x32xf32> to vector<8x32xf32>
    %34 = arith.addf %33, %32 : vector<8x32xf32>
    %35 = vector.extract_strided_slice %7 {offsets = [0, 8], sizes = [8, 8], strides = [1, 1]} : vector<8x96xf32> to vector<8x8xf32>
    %cst_14 = arith.constant 0.353553385 : f32
    %36 = vector.broadcast %cst_14 : f32 to vector<8x8xf32>
    %37 = arith.mulf %35, %36 : vector<8x8xf32>
    %38 = arith.truncf %37 : vector<8x8xf32> to vector<8x8xbf16>
    %39 = vector.extract_strided_slice %7 {offsets = [0, 40], sizes = [8, 8], strides = [1, 1]} : vector<8x96xf32> to vector<8x8xf32>
    %40 = arith.truncf %39 : vector<8x8xf32> to vector<8x8xbf16>
    %41 = vector.extract_strided_slice %7 {offsets = [0, 72], sizes = [8, 8], strides = [1, 1]} : vector<8x96xf32> to vector<8x8xf32>
    %42 = arith.truncf %41 : vector<8x8xf32> to vector<8x8xbf16>
    %cst_15 = arith.constant dense<0.000000e+00> : vector<8x8xf32>
    %43 = tpu.matmul %38, %40, %cst_15 {dimension_numbers = #tpu.dot_dimension_numbers<[1], [1], [0], [0], [0, 0, 1, 0], [], []>} : vector<8x8xbf16>, vector<8x8xbf16>, vector<8x8xf32> -> vector<8x8xf32>
    %cst_16 = arith.constant dense<0xFF800000> : vector<8xf32>
    %44 = vector.multi_reduction <maximumf>, %43, %cst_16 [1] : vector<8x8xf32> to vector<8xf32>
    %45 = vector.shape_cast %44 : vector<8xf32> to vector<8x1xf32>
    %46 = vector.broadcast %45 : vector<8x1xf32> to vector<8x8xf32>
    %47 = arith.subf %43, %46 : vector<8x8xf32>
    %48 = math.exp %47 : vector<8x8xf32>
    %cst_17 = arith.constant dense<0.000000e+00> : vector<8xf32>
    %49 = vector.multi_reduction <add>, %48, %cst_17 [1] : vector<8x8xf32> to vector<8xf32>
    %50 = vector.shape_cast %49 : vector<8xf32> to vector<8x1xf32>
    %51 = tpu.reciprocal %50 {approx = true} : vector<8x1xf32> -> vector<8x1xf32>
    %52 = vector.broadcast %51 : vector<8x1xf32> to vector<8x8xf32>
    %53 = arith.mulf %48, %52 : vector<8x8xf32>
    %54 = arith.truncf %53 : vector<8x8xf32> to vector<8x8xbf16>
    %cst_18 = arith.constant dense<0.000000e+00> : vector<8x8xf32>
    %55 = tpu.matmul %54, %42, %cst_18 {dimension_numbers = #tpu.dot_dimension_numbers<[1], [0], [0], [1], [0, 0, 1, 1], [], []>} : vector<8x8xbf16>, vector<8x8xbf16>, vector<8x8xf32> -> vector<8x8xf32>
    %56 = arith.truncf %55 : vector<8x8xf32> to vector<8x8xbf16>
    %57 = vector.extract_strided_slice %6 {offsets = [8, 0], sizes = [8, 32], strides = [1, 1]} : vector<32x32xbf16> to vector<8x32xbf16>
    %cst_19 = arith.constant dense<0.000000e+00> : vector<8x32xf32>
    %58 = tpu.matmul %56, %57, %cst_19 {dimension_numbers = #tpu.dot_dimension_numbers<[1], [0], [0], [1], [0, 0, 1, 1], [], []>} : vector<8x8xbf16>, vector<8x32xbf16>, vector<8x32xf32> -> vector<8x32xf32>
    %59 = arith.addf %34, %58 : vector<8x32xf32>
    %60 = vector.extract_strided_slice %7 {offsets = [0, 16], sizes = [8, 8], strides = [1, 1]} : vector<8x96xf32> to vector<8x8xf32>
    %cst_20 = arith.constant 0.353553385 : f32
    %61 = vector.broadcast %cst_20 : f32 to vector<8x8xf32>
    %62 = arith.mulf %60, %61 : vector<8x8xf32>
    %63 = arith.truncf %62 : vector<8x8xf32> to vector<8x8xbf16>
    %64 = vector.extract_strided_slice %7 {offsets = [0, 48], sizes = [8, 8], strides = [1, 1]} : vector<8x96xf32> to vector<8x8xf32>
    %65 = arith.truncf %64 : vector<8x8xf32> to vector<8x8xbf16>
    %66 = vector.extract_strided_slice %7 {offsets = [0, 80], sizes = [8, 8], strides = [1, 1]} : vector<8x96xf32> to vector<8x8xf32>
    %67 = arith.truncf %66 : vector<8x8xf32> to vector<8x8xbf16>
    %cst_21 = arith.constant dense<0.000000e+00> : vector<8x8xf32>
    %68 = tpu.matmul %63, %65, %cst_21 {dimension_numbers = #tpu.dot_dimension_numbers<[1], [1], [0], [0], [0, 0, 1, 0], [], []>} : vector<8x8xbf16>, vector<8x8xbf16>, vector<8x8xf32> -> vector<8x8xf32>
    %cst_22 = arith.constant dense<0xFF800000> : vector<8xf32>
    %69 = vector.multi_reduction <maximumf>, %68, %cst_22 [1] : vector<8x8xf32> to vector<8xf32>
    %70 = vector.shape_cast %69 : vector<8xf32> to vector<8x1xf32>
    %71 = vector.broadcast %70 : vector<8x1xf32> to vector<8x8xf32>
    %72 = arith.subf %68, %71 : vector<8x8xf32>
    %73 = math.exp %72 : vector<8x8xf32>
    %cst_23 = arith.constant dense<0.000000e+00> : vector<8xf32>
    %74 = vector.multi_reduction <add>, %73, %cst_23 [1] : vector<8x8xf32> to vector<8xf32>
    %75 = vector.shape_cast %74 : vector<8xf32> to vector<8x1xf32>
    %76 = tpu.reciprocal %75 {approx = true} : vector<8x1xf32> -> vector<8x1xf32>
    %77 = vector.broadcast %76 : vector<8x1xf32> to vector<8x8xf32>
    %78 = arith.mulf %73, %77 : vector<8x8xf32>
    %79 = arith.truncf %78 : vector<8x8xf32> to vector<8x8xbf16>
    %cst_24 = arith.constant dense<0.000000e+00> : vector<8x8xf32>
    %80 = tpu.matmul %79, %67, %cst_24 {dimension_numbers = #tpu.dot_dimension_numbers<[1], [0], [0], [1], [0, 0, 1, 1], [], []>} : vector<8x8xbf16>, vector<8x8xbf16>, vector<8x8xf32> -> vector<8x8xf32>
    %81 = arith.truncf %80 : vector<8x8xf32> to vector<8x8xbf16>
    %82 = vector.extract_strided_slice %6 {offsets = [16, 0], sizes = [8, 32], strides = [1, 1]} : vector<32x32xbf16> to vector<8x32xbf16>
    %cst_25 = arith.constant dense<0.000000e+00> : vector<8x32xf32>
    %83 = tpu.matmul %81, %82, %cst_25 {dimension_numbers = #tpu.dot_dimension_numbers<[1], [0], [0], [1], [0, 0, 1, 1], [], []>} : vector<8x8xbf16>, vector<8x32xbf16>, vector<8x32xf32> -> vector<8x32xf32>
    %84 = arith.addf %59, %83 : vector<8x32xf32>
    %85 = vector.extract_strided_slice %7 {offsets = [0, 24], sizes = [8, 8], strides = [1, 1]} : vector<8x96xf32> to vector<8x8xf32>
    %cst_26 = arith.constant 0.353553385 : f32
    %86 = vector.broadcast %cst_26 : f32 to vector<8x8xf32>
    %87 = arith.mulf %85, %86 : vector<8x8xf32>
    %88 = arith.truncf %87 : vector<8x8xf32> to vector<8x8xbf16>
    %89 = vector.extract_strided_slice %7 {offsets = [0, 56], sizes = [8, 8], strides = [1, 1]} : vector<8x96xf32> to vector<8x8xf32>
    %90 = arith.truncf %89 : vector<8x8xf32> to vector<8x8xbf16>
    %91 = vector.extract_strided_slice %7 {offsets = [0, 88], sizes = [8, 8], strides = [1, 1]} : vector<8x96xf32> to vector<8x8xf32>
    %92 = arith.truncf %91 : vector<8x8xf32> to vector<8x8xbf16>
    %cst_27 = arith.constant dense<0.000000e+00> : vector<8x8xf32>
    %93 = tpu.matmul %88, %90, %cst_27 {dimension_numbers = #tpu.dot_dimension_numbers<[1], [1], [0], [0], [0, 0, 1, 0], [], []>} : vector<8x8xbf16>, vector<8x8xbf16>, vector<8x8xf32> -> vector<8x8xf32>
    %cst_28 = arith.constant dense<0xFF800000> : vector<8xf32>
    %94 = vector.multi_reduction <maximumf>, %93, %cst_28 [1] : vector<8x8xf32> to vector<8xf32>
    %95 = vector.shape_cast %94 : vector<8xf32> to vector<8x1xf32>
    %96 = vector.broadcast %95 : vector<8x1xf32> to vector<8x8xf32>
    %97 = arith.subf %93, %96 : vector<8x8xf32>
    %98 = math.exp %97 : vector<8x8xf32>
    %cst_29 = arith.constant dense<0.000000e+00> : vector<8xf32>
    %99 = vector.multi_reduction <add>, %98, %cst_29 [1] : vector<8x8xf32> to vector<8xf32>
    %100 = vector.shape_cast %99 : vector<8xf32> to vector<8x1xf32>
    %101 = tpu.reciprocal %100 {approx = true} : vector<8x1xf32> -> vector<8x1xf32>
    %102 = vector.broadcast %101 : vector<8x1xf32> to vector<8x8xf32>
    %103 = arith.mulf %98, %102 : vector<8x8xf32>
    %104 = arith.truncf %103 : vector<8x8xf32> to vector<8x8xbf16>
    %cst_30 = arith.constant dense<0.000000e+00> : vector<8x8xf32>
    %105 = tpu.matmul %104, %92, %cst_30 {dimension_numbers = #tpu.dot_dimension_numbers<[1], [0], [0], [1], [0, 0, 1, 1], [], []>} : vector<8x8xbf16>, vector<8x8xbf16>, vector<8x8xf32> -> vector<8x8xf32>
    %106 = arith.truncf %105 : vector<8x8xf32> to vector<8x8xbf16>
    %107 = vector.extract_strided_slice %6 {offsets = [24, 0], sizes = [8, 32], strides = [1, 1]} : vector<32x32xbf16> to vector<8x32xbf16>
    %cst_31 = arith.constant dense<0.000000e+00> : vector<8x32xf32>
    %108 = tpu.matmul %106, %107, %cst_31 {dimension_numbers = #tpu.dot_dimension_numbers<[1], [0], [0], [1], [0, 0, 1, 1], [], []>} : vector<8x8xbf16>, vector<8x32xbf16>, vector<8x32xf32> -> vector<8x32xf32>
    %109 = arith.addf %84, %108 : vector<8x32xf32>
    %c0_32 = arith.constant 0 : index
    %c0_33 = arith.constant 0 : index
    %c0_34 = arith.constant 0 : index
    %110 = vector.load %arg5[%c0_32, %c0_33, %c0_34] : memref<1x8x32xf32, #tpu.memory_space<vmem>>, vector<1x8x32xf32>
    %111 = vector.shape_cast %110 : vector<1x8x32xf32> to vector<8x32xf32>
    %112 = vector.shape_cast %109 : vector<8x32xf32> to vector<1x8x32xf32>
    tpu.vector_store %arg5[%c0_32, %c0_33, %c0_34], %112 {strides = array<i32>} : memref<1x8x32xf32, #tpu.memory_space<vmem>>, vector<1x8x32xf32>,
    return
  }
  func.func @transform_0(%arg0: i32) -> (i32, i32, i32) {
    %c0_i32 = arith.constant 0 : i32
    %c0_i32_0 = arith.constant 0 : i32
    %c0_i32_1 = arith.constant 0 : i32
    return %arg0, %c0_i32, %c0_i32_0 : i32, i32, i32
  }
  func.func @transform_1(%arg0: i32) -> (i32, i32) {
    %c0_i32 = arith.constant 0 : i32
    %c0_i32_0 = arith.constant 0 : i32
    %c0_i32_1 = arith.constant 0 : i32
    return %c0_i32, %c0_i32_0 : i32, i32
  }
  func.func @transform_2(%arg0: i32) -> (i32, i32) {
    %c0_i32 = arith.constant 0 : i32
    %c0_i32_0 = arith.constant 0 : i32
    %c0_i32_1 = arith.constant 0 : i32
    return %c0_i32, %c0_i32_0 : i32, i32
  }
  func.func @transform_3(%arg0: i32) -> (i32, i32) {
    %c0_i32 = arith.constant 0 : i32
    %c0_i32_0 = arith.constant 0 : i32
    %c0_i32_1 = arith.constant 0 : i32
    return %c0_i32, %c0_i32_0 : i32, i32
  }
  func.func @transform_4(%arg0: i32) -> (i32, i32, i32) {
    %c0_i32 = arith.constant 0 : i32
    %c0_i32_0 = arith.constant 0 : i32
    %c0_i32_1 = arith.constant 0 : i32
    return %arg0, %c0_i32, %c0_i32_0 : i32, i32, i32
  }
}

</mosaic_0001>

<bundles_post_ra>
// kernel: tpu_custom_call.1
= control target key start
LH: loop header
LB: loop body
LE: loop exit
PB: predicated region body
PF: predicated region fallthrough
CT: control target
= control target key end

     0   :  { %9 = vsyncpa [#allocation3], 0  ;;  %s1833_s0 = inlined_call_operand.hbm [shape: f32[2,8,32], index: 0, kind: input, shape index: {}]   ;;  %s1834_s1 = inlined_call_operand.hbm [shape: f32[32,96], index: 1, kind: input, shape index: {}]   ;;  %s1835_s2 = inlined_call_operand.hbm [shape: f32[32,32], index: 2, kind: input, shape index: {}]   ;;  %s1836_s3 = inlined_call_operand.vmem [shape: f32[1,32], index: 3, kind: input, shape index: {}]   ;;  %s1837_s4 = inlined_call_operand.hbm [shape: f32[2,8,32], index: 4, kind: output, shape index: {}]  }
   0x1   :  { %11 = vsyncpa [#allocation3 + $0x1], 0 }
   0x2   :  { %12 = vsyncpa [#allocation6], 0 }
   0x3   :  { %13 = vsyncpa [#allocation4], 0 }
   0x4   :  { %15 = vsyncpa [#allocation4 + $0x1], 0  ;;  %s1503_s15 = smov 0   ;;  %s1505_s16 = smov 0  }
   0x5   :  { %s1507_s17 = smov 0   ;;  %s1509_s18 = smov 0  }
   0x6 LB: > { %s1524_s19 = sadd.s32 4294967295, %s1457_s18   ;;  %s1053_s20 = sadd.s32 4294967294, %s1457_s18   ;;  %s1457_s18 = sphi %s1509_s18, %s1857_s18   ;;  %s1453_s17 = sphi %s1507_s17, %s1856_s17   ;;  %s1449_s16 = sphi %s1505_s16, %s1855_s16   ;;  %s1445_s15 = sphi %s1503_s15, %s1854_s15  }
   0x7   : > { %p41_p0 = scmp.ne.s32.totalorder %s1449_s16, %s1445_s15  ;;  %p1838_p1 = scmp.eq.s32.totalorder %s1524_s19, 0 }
   0x8   : > { %p134_p3 = scmp.eq.s32.totalorder %s1053_s20, 1  ;;  %p1054_p5 = scmp.ge.s32.totalorder %s1457_s18, 1 }
   0x9   : > { %p1533_p4 = por %p1838_p1, %p41_p0  ;;  %p141_p7 = scmp.lt.s32.totalorder %s1457_s18, 3 }
   0xa   : > { %p1538_p6 = por %p134_p3, %p41_p0  ;;  %s1459_s24 = smov [#allocation5]  }
   0xb   : > { %s1841_s21 = scalar_select %p1533_p4, 1, 0 }
   0xc   : > { %s1842_s22 = scalar_select %p1538_p6, 1, 0 }
   0xd   : > { %p1543_p8 = pnand %p1054_p5, %p141_p7  ;;  %s153_s25 = sshll.u32 %s1459_s24, 4  ;;  %s1547_s25 = int_to_ptr.vmem [resolvable:$true] %s153_s25 }
   0xe   : > { %s1460_s27 = smov [#allocation7]   ;;  %s1301_s5 = scalar_lea.hbm %s1834_s1, 512 }
   0xf   : > { %p1215_p9 = pneg %p1543_p8  ;;  %s166_s28 = sshll.u32 %s1460_s27, 4  ;;  %s1558_s28 = int_to_ptr.vmem [resolvable:$true] %s166_s28 }
  0x10   : > { %p1302_p12 = scmp.ne.s32.totalorder %s1834_s1, %s1301_s5  ;;  %p1308_p5 = scmp.lt.u32.totalorder %s1301_s5, %s1834_s1 }
  0x11   : > { %p1554_p11 = pnand %p1215_p9, %p1838_p1 }
  0x13   : > { %p1303_p13 = pneg %p1554_p11 }
  0x15   : > { %p1304_p0 = pnand %p1303_p13, %p1302_p12 }
  0x17   : > { %p1305_p3 = pneg %p1304_p0 }
  0x19   : > { %p1310_p7 = pnand %p1308_p5, %p1305_p3 }
  0x1b   : > { %1313 = shalt.err (!%p1310_p7)
}
  0x1c   : > { %s1314_s10 = scalar_lea.vmem %s1547_s25, 512  ;;  %p1322_p2 = scmp.lt.s32.totalorder %s1547_s25, %s1547_s25 }
  0x1d   : > { %p1315_p9 = scmp.ne.s32.totalorder %s1547_s25, %s1314_s10  ;;  %p1323_p12 = scmp.lt.s32.totalorder %s1314_s10, %s1314_s10 }
  0x1f   : > { %p1317_p10 = pnand %p1315_p9, %p1303_p13  ;;  %p1324_p0 = por %p1323_p12, %p1322_p2 }
  0x21   : > { %p1318_p1 = pneg %p1317_p10 }
  0x23   : > { %p1325_p6 = pnand %p1324_p0, %p1318_p1 }
  0x25   : > { %1328 = shalt.err (!%p1325_p6)
}
  0x26   : > { %s1461_s11 = smov 128   ;;  %s1462_s12 = smov 8  }
  0x27   : > { %1218 = dma.hbm_to_vmem [thread:$0]  (!%p1554_p11), %s1834_s1, 512, %s1547_s25, [#allocation6], %s1461_s11, %s1461_s11, %s1462_s12  }
  0x28   : > { %s1329_s27 = scalar_lea.hbm %s1835_s2, 512 }
  0x29   : > { %p1330_p2 = scmp.ne.s32.totalorder %s1835_s2, %s1329_s27  ;;  %p1336_p10 = scmp.lt.u32.totalorder %s1329_s27, %s1835_s2 }
  0x2b   : > { %p1332_p1 = pnand %p1330_p2, %p1303_p13 }
  0x2d   : > { %p1333_p6 = pneg %p1332_p1 }
  0x2f   : > { %p1338_p3 = pnand %p1336_p10, %p1333_p6 }
  0x31   : > { %1341 = shalt.err (!%p1338_p3)
}
  0x32   : > { %s1342_s25 = scalar_lea.vmem %s1558_s28, 512  ;;  %p1350_p12 = scmp.lt.s32.totalorder %s1558_s28, %s1558_s28 }
  0x33   : > { %p1343_p5 = scmp.ne.s32.totalorder %s1558_s28, %s1342_s25  ;;  %p1351_p0 = scmp.lt.s32.totalorder %s1342_s25, %s1342_s25 }
  0x35   : > { %p1345_p7 = pnand %p1343_p5, %p1303_p13  ;;  %p1352_p2 = por %p1351_p0, %p1350_p12 }
  0x37   : > { %p1346_p9 = pneg %p1345_p7 }
  0x39   : > { %p1353_p1 = pnand %p1352_p2, %p1346_p9 }
  0x3b   : > { %1356 = shalt.err (!%p1353_p1)
}
  0x3c   : > { %1221 = dma.hbm_to_vmem [thread:$0]  (!%p1554_p11), %s1835_s2, 512, %s1558_s28, [#allocation6], %s1461_s11, %s1461_s11, %s1462_s12  }
  0x3d   : > { %s1613_s9 = sadd.s32 1, %s1457_s18   ;;  %s28_s26 = sadd.s32 1, %s1453_s17 }
  0x3e   : > { %s25_s10 = ssub.s32 %s1457_s18, %s1613_s9  ;;  %p35_p13 = scmp.ne.s32.totalorder %s1453_s17, %s1449_s16 }
  0x3f   : > { %p26_p6 = scmp.eq.s32.totalorder %s25_s10, 0  ;;  %p36_p10 = scmp.eq.s32.totalorder %s1457_s18, 0 }
  0x40   : > { %p1845_p3 = scmp.eq.s32.totalorder %s1524_s19, 1  ;;  %p1232_p7 = scmp.lt.s32.totalorder %s1457_s18, 2 }
  0x41   : > { %s1629_s14 = scalar_select %p26_p6, %s1453_s17, %s28_s26  }
  0x42   : > { %p1623_p5 = por %p1845_p3, %p35_p13  ;;  %p37_p9 = por %p36_p10, %p35_p13 }
  0x43   : > { %s183_s20 = sand.u32 1, %s1453_s17   ;;  %s1059_s28 = sshll.u32 %s1457_s18, 7 }
  0x44   : > { %s1846_s13 = scalar_select %p1623_p5, 1, 0 }
  0x45   : > { %s1058_s24 = sshll.u32 %s183_s20, 3  ;;  %s1636_s27 = scalar_lea.hbm %s1833_s0, %s1059_s28 }
  0x46   : > { %s187_s29 = scalar_lea.vmem [#allocation2], %s1058_s24  ;;  %p1640_p11 = pnand %p1232_p7, %p37_p9 }
  0x47   : > { %s194_s30 = sshll.u32 %s187_s29, 4  ;;  %s184_s6 = scalar_lea.sflag [#allocation3], %s183_s20  ;;  %s1638_s30 = int_to_ptr.vmem [resolvable:$true] %s194_s30 }
  0x48   : > { %s1357_s25 = scalar_lea.hbm %s1636_s27, 128  ;;  %p1359_p0 = pneg %p1640_p11 }
  0x49   : > { %p1358_p12 = scmp.ne.s32.totalorder %s1636_s27, %s1357_s25  ;;  %s1362_s26 = scalar_lea.hbm %s1833_s0, 256 }
  0x4a   : > { %p1363_p13 = scmp.lt.u32.totalorder %s1636_s27, %s1833_s0  ;;  %p1364_p6 = scmp.lt.u32.totalorder %s1362_s26, %s1357_s25 }
  0x4b   : > { %p1360_p2 = pnand %p1359_p0, %p1358_p12  ;;  %p1366_p3 = scmp.lt.u32.totalorder %s1357_s25, %s1636_s27 }
  0x4c   : > { %p1365_p10 = por %p1364_p6, %p1363_p13 }
  0x4d   : > { %p1361_p1 = pneg %p1360_p2 }
  0x4e   : > { %p1367_p7 = por %p1366_p3, %p1365_p10 }
  0x50   : > { %p1368_p9 = pnand %p1367_p7, %p1361_p1 }
  0x52   : > { %1371 = shalt.err (!%p1368_p9)
}
  0x53   : > { %s1372_s20 = scalar_lea.vmem %s1638_s30, 128  ;;  %s1463_s28 = smov [#allocation2]  }
  0x54   : > { %p1373_p12 = scmp.ne.s32.totalorder %s1638_s30, %s1372_s20  ;;  %s1377_s11 = sshll.u32 %s1463_s28, 4  ;;  %s1378_s11 = int_to_ptr.vmem [resolvable:$false] %s1377_s11 }
  0x55   : > { %s1379_s12 = scalar_lea.vmem %s1378_s11, 256  ;;  %p1380_p4 = scmp.lt.s32.totalorder %s1638_s30, %s1378_s11 }
  0x56   : > { %p1375_p2 = pnand %p1373_p12, %p1359_p0  ;;  %p1381_p13 = scmp.lt.s32.totalorder %s1379_s12, %s1372_s20 }
  0x58   : > { %p1376_p5 = pneg %p1375_p2  ;;  %p1382_p6 = por %p1381_p13, %p1380_p4 }
  0x5a   : > { %p1383_p10 = pnand %p1382_p6, %p1376_p5 }
  0x5c   : > { %1386 = shalt.err (!%p1383_p10)
}
  0x5d   : > { %1225 = dma.hbm_to_vmem [thread:$0]  (!%p1640_p11), %s1636_s27, 128, %s1638_s30, %s184_s6  }
  0x5e   : > { %203 = sbr.rel (%p1543_p8) target bundleno = 2502 (0x9c6), region = 36  ;;  %s1672_s29 = sand.u32 (!%p1543_p8), 1, %s1449_s16  }
  0x5f   : > { %s1061_s25 = sshll.u32 (!%p1543_p8), %s1672_s29, 3  ;;  %s206_s7 = scalar_lea.sflag (!%p1543_p8), [#allocation3], %s1672_s29 }
  0x60   : > { %s209_s8 = scalar_lea.vmem (!%p1543_p8), [#allocation2], %s1061_s25  ;;  %p1848_p4 = scmp.ne.s32.totalorder (!%p1543_p8), %s1841_s21, 0 }
  0x65   : > { %1432 = dma.done.wait (%p1848_p4), %s206_s7, 128  }
  0x66   : > { %1434 = vsyncadd (%p1848_p4), %s206_s7, 4294967168  ;;  %p1849_p5 = scmp.eq.s32.totalorder %s1524_s19, 0 }
  0x68   : > { %1436 = dma.done.wait (%p1849_p5), [#allocation6], 1024   ;;  %p1850_p8 = pmov %p1849_p5 }
  0x69   : > { %v1464_v0 = vmov 0.0   ;;  %vm1465_vm0 = vmmov 0   ;;  %v245_v1 = vld [vmem:[#allocation5] sm:$0xff]  ;;  %v246_v2 = vld [vmem:[#allocation5 + $0x8] sm:$0xff]  ;;  %v247_v3 = vld [vmem:[#allocation5 + $0x10] sm:$0xff]  ;;  %vm257_vm1 = vcmask 261120  }
  0x6a   : > { %1438 = vsyncadd (%p1850_p8), [#allocation6], 4294966272  ;;  %1110 = vmatprep.subr.bf16.mxu0 %v1464_v0  ;;  %1114 = vmatprep.mubr.msk.bf16.mxu0 %vm1465_vm0, %v1464_v0  ;;  %v249_v4 = vpack.c.bf16 %v246_v2, %v245_v1  ;;  %v248_v5 = vld [vmem:[#allocation5 + $0x18] sm:$0xff]  ;;  %s1466_s21 = smov 64   ;;  %s1467_s23 = smov 96   ;;  %vm372_vm2 = vcmask 1043456  }
  0x6b   : > { %1118 = vmatprep.subr.bf16.mxu1 %v1464_v0  ;;  %1120 = vmatprep.mubr.msk.bf16.mxu1 %vm1465_vm0, %v1464_v0  ;;  %v250_v6 = vpack.c.bf16 %v248_v5, %v247_v3  ;;  %v243_v7 = vld [vmem:[%s209_s8] sm:$0xff]  ;;  %s1468_s27 = smov 88   ;;  %vm308_vm3 = vcmask 64512   ;;  %s1469_s30 = smov 120   ;;  %v251_v40 = vld [vmem:[#allocation7] sm:$0xff]  ;;  %v252_v41 = vld [vmem:[#allocation7 + $0x8] sm:$0xff] }
  0x6c   : > { %1111 = vmatpush3.bf16.msra.mxu0 %v249_v4  ;;  %v244_v8 = vpack.c.bf16 %v243_v7, %v243_v7  ;;  %s1470_s5 = smov 80   ;;  %s1471_s6 = smov 112   ;;  %v1730_v42 = vpack.c.bf16 %v252_v41, %v251_v40 }
  0x6d   : > { %1112 = vmatprep.subr.bf16.mxu0 %v1464_v0  ;;  %s1472_s26 = smov 48   ;;  %s1473_s10 = smov 72  }
  0x6e   : > { %v421_v43 = vsel %vm372_vm2, %v1730_v42, 0  ;;  %s1474_s24 = smov 104   ;;  %s1475_s20 = smov 56  }
  0x6f   : > { %s1476_s28 = smov 40   ;;  %s1080_s7 = sshll.u32 %s1524_s19, 7 }
  0x70   : > { %1113 = vmatpush3.bf16.msra.mxu0 %v250_v6  ;;  %s241_s8 = scalar_lea.vmem [#allocation8], %s1061_s25  ;;  %s951_s19 = scalar_lea.sflag [#allocation4], %s1672_s29 }
  0x71   : > { %1124 = vmatprep.subr.bf16.mxu0 %v1464_v0  ;;  %p1851_p0 = scmp.ne.s32.totalorder %s1846_s13, 0 }
  0x73   : > { %1115 = vmatmul.mubr.msk.bf16.vlgmr.msra.gmra.mrb[0].mxu0 %vm257_vm1, %v244_v8 }
  0x74   : > { %1126 = vmatprep.mubr.msk.bf16.mxu0 %vm1465_vm0, %v1464_v0 }
 0x146   : > { %v295_v9 = vpop.f32.mrb[0].mxu0 }
 0x147   : > { %v1697_v10 = vpack.c.bf16 %v295_v9, %v295_v9  ;;  %v1116_v11 = vpop.f32.mrb[1].mxu0  ;;  %v302_v18 = vmul.f32 0.35355338, %v295_v9 }
 0x148   : > { %v298_v12 = vpop.f32.mrb[2].mxu0 }
 0x149   : > { %367 = vrot.lane.b32.xlu1 %v1697_v10, %s1466_s21  ;;  %306 = vrot.lane.b32.xlu0 %v1697_v10, %s1467_s23  ;;  %v1117_v13 = vpop.f32.mrb[3].mxu0  ;;  %v1706_v19 = vpack.c.bf16 %v302_v18, %v302_v18  ;;  %s964_s21 = sshll.u32 %s241_s8, 4  ;;  %s1790_s21 = int_to_ptr.vmem [resolvable:$true] %s964_s21 }
 0x14a   : > { %s1387_s25 = scalar_lea.vmem %s1790_s21, 128 }
 0x14b   : > { %p1388_p11 = scmp.ne.s32.totalorder %s1790_s21, %s1387_s25 }
 0x14d   : > { %473 = vrot.lane.b32.xlu1 %v1697_v10, %s1468_s27  ;;  %p1389_p1 = pnand %p1388_p11, %p1851_p0 }
 0x14f   : > { %p1390_p3 = pneg %p1389_p1 }
 0x1bb   : > { %v368_v14 = vpop.permute.xlu1 %367  ;;  %v307_v15 = vpop.permute.xlu0 %306 }
 0x1bc   : > { %v374_v16 = vsel %vm372_vm2, %v368_v14, 0  ;;  %v313_v17 = vsel %vm308_vm3, %v307_v15, 0 }
 0x1bd   : > { %1119 = vmatpush3.bf16.xpose.msra.mxu1 %v313_v17  ;;  %1125 = vmatpush3.bf16.msra.mxu0 %v374_v16 }
 0x1be   : > { %1136 = vmatprep.subr.bf16.mxu0 %v1464_v0  ;;  %1130 = vmatprep.subr.bf16.mxu1 %v1464_v0 }
 0x1bf   : > { %v474_v30 = vpop.permute.xlu1 %473 }
 0x1c0   : > { %v479_v36 = vsel %vm308_vm3, %v474_v30, 0 }
 0x1c4   : > { %1121 = vmatmul.mubr.msk.bf16.vlgmr.msra.gmra.mrb[0].mxu1 %vm308_vm3, %v1706_v19 }
 0x1c5   : > { %1132 = vmatprep.mubr.msk.bf16.mxu1 %vm1465_vm0, %v1464_v0  ;;  %1131 = vmatpush3.bf16.msra.mxu1 %v421_v43 }
 0x1c6   : > { %1142 = vmatprep.subr.bf16.mxu1 %v1464_v0 }
 0x297   : > { %v349_v20 = vpop.f32.mrb[0].mxu1 }
 0x298   : > { %v1122_v21 = vpop.f32.mrb[1].mxu1  ;;  %v355_v22 = vsel %vm308_vm3, %v349_v20, -inf }
 0x299   : > { %356 = vmax.xlane.f32.xlu0 %v355_v22  ;;  %v352_v23 = vpop.f32.mrb[2].mxu1  ;;  %v583_v22 = vrot.slane %v1730_v42, 4 }
 0x29a   : > { %v1123_v24 = vpop.f32.mrb[3].mxu1 }
 0x29b   : > { %v588_v23 = vsel %vm372_vm2, %v583_v22, 0 }
 0x326   : > { %v357_v25 = vpop.xlane.xlu0 %356 }
 0x327   : > { %v358_v26 = vsub.f32 %v349_v20, %v357_v25 }
 0x329   : > { %v359_v27 = vmul.f32 1.442695, %v358_v26 }
 0x32b   : > { %1285 = vpow2.f32 %v359_v27 }
 0x335   : > { %v1286_v28 = vpop.eup %1285 }
 0x336   : > { %v361_v29 = vsel %vm308_vm3, %v1286_v28, 0.0 }
 0x337   : > { %362 = vadd.xlane.f32.xlu1 %v361_v29 }
 0x348   : > { %471 = vrot.lane.b32.xlu1 %v1706_v19, %s1469_s30  ;;  %s1788_s30 = scalar_lea.hbm %s1837_s4, %s1080_s7 }
 0x34c   : > { %633 = vrot.lane.b32.xlu1 %v1697_v10, %s1470_s5  ;;  %s1477_s5 = smov [#allocation8]  }
 0x350   : > { %631 = vrot.lane.b32.xlu1 %v1706_v19, %s1471_s6  ;;  %s1391_s6 = sshll.u32 %s1477_s5, 4  ;;  %s1392_s6 = int_to_ptr.vmem [resolvable:$false] %s1391_s6 }
 0x351   : > { %p1394_p7 = scmp.lt.s32.totalorder %s1790_s21, %s1392_s6 }
 0x3c4   : > { %v363_v31 = vpop.xlane.xlu1 %362 }
 0x3c5   : > { %1287 = vrcp.f32 %v363_v31 }
 0x3c8   : > { %v472_v35 = vpop.permute.xlu1 %471 }
 0x3cc   : > { %v634_v37 = vpop.permute.xlu1 %633 }
 0x3cd   : > { %v639_v38 = vsel %vm308_vm3, %v634_v37, 0 }
 0x3cf   : > { %v1288_v32 = vpop.eup %1287 }
 0x3d0   : > { %v365_v33 = vmul.f32 %v1288_v32, %v1286_v28  ;;  %v632_v39 = vpop.permute.xlu1 %631 }
 0x3d2   : > { %v366_v34 = vpack.c.bf16 %v365_v33, %v365_v33  ;;  %v253_v33 = vld [vmem:[#allocation7 + $0x10] sm:$0xff] }
 0x3d4   : > { %1127 = vmatmul.mubr.msk.bf16.vlgmr.msra.gmra.mrb[4].mxu0 %vm308_vm3, %v366_v34  ;;  %v254_v34 = vld [vmem:[#allocation7 + $0x18] sm:$0xff] }
 0x3d5   : > { %1137 = vmatpush3.bf16.xpose.msra.mxu0 %v479_v36  ;;  %1138 = vmatprep.mubr.msk.bf16.mxu0 %vm1465_vm0, %v1464_v0 }
 0x3d6   : > { %1154 = vmatprep.subr.bf16.mxu0 %v1464_v0 }
 0x3dc   : > { %1139 = vmatmul.mubr.msk.bf16.vlgmr.msra.gmra.mrb[8].mxu0 %vm308_vm3, %v472_v35  ;;  %v256_v35 = vpack.c.bf16 %v254_v34, %v253_v33 }
 0x3dd   : > { %1155 = vmatpush3.bf16.xpose.msra.mxu0 %v639_v38  ;;  %1156 = vmatprep.mubr.msk.bf16.mxu0 %vm1465_vm0, %v1464_v0 }
 0x3de   : > { %1160 = vmatprep.subr.bf16.mxu0 %v1464_v0 }
 0x3e4   : > { %1157 = vmatmul.mubr.msk.bf16.vlgmr.msra.gmra.mrb[12].mxu0 %vm308_vm3, %v632_v39  ;;  %v746_v39 = vsel %vm372_vm2, %v256_v35, 0 }
 0x3e5   : > { %1162 = vmatprep.mubr.msk.bf16.mxu0 %vm1465_vm0, %v1464_v0 }
 0x4a7   : > { %v410_v44 = vpop.f32.mrb[4].mxu0 }
 0x4a8   : > { %v416_v45 = vpack.c.bf16 %v410_v44, %v410_v44  ;;  %v1128_v46 = vpop.f32.mrb[5].mxu0 }
 0x4a9   : > { %v413_v47 = vpop.f32.mrb[6].mxu0 }
 0x4aa   : > { %v1129_v48 = vpop.f32.mrb[7].mxu0  ;;  %1133 = vmatmul.mubr.msk.bf16.vlgmr.msra.gmra.mrb[4].mxu1 %vm308_vm3, %v416_v45 }
 0x4ab   : > { %1144 = vmatprep.mubr.msk.bf16.mxu1 %vm1465_vm0, %v1464_v0 }
 0x4af   : > { %v515_v49 = vpop.f32.mrb[8].mxu0 }
 0x4b0   : > { %v1140_v50 = vpop.f32.mrb[9].mxu0  ;;  %v521_v58 = vsel %vm308_vm3, %v515_v49, -inf }
 0x4b1   : > { %v518_v51 = vpop.f32.mrb[10].mxu0 }
 0x4b2   : > { %v1141_v52 = vpop.f32.mrb[11].mxu0  ;;  %v901_v51 = vrot.slane %v256_v35, 4 }
 0x4b7   : > { %v675_v53 = vpop.f32.mrb[12].mxu0 }
 0x4b8   : > { %v1158_v54 = vpop.f32.mrb[13].mxu0  ;;  %v681_v55 = vsel %vm308_vm3, %v675_v53, -inf }
 0x4b9   : > { %682 = vmax.xlane.f32.xlu0 %v681_v55  ;;  %v678_v56 = vpop.f32.mrb[14].mxu0  ;;  %v906_v55 = vsel %vm372_vm2, %v901_v51, 0 }
 0x4ba   : > { %v1159_v57 = vpop.f32.mrb[15].mxu0 }
 0x4cf   : > { %693 = vrot.lane.b32.xlu0 %v1697_v10, %s1472_s26  ;;  %s1393_s26 = scalar_lea.vmem %s1392_s6, 256 }
 0x4d0   : > { %p1395_p9 = scmp.lt.s32.totalorder %s1393_s26, %s1387_s25 }
 0x4d2   : > { %p1396_p12 = por %p1395_p9, %p1394_p7 }
 0x4d3   : > { %791 = vrot.lane.b32.xlu0 %v1697_v10, %s1473_s10 }
 0x4d4   : > { %p1397_p2 = pnand %p1396_p12, %p1390_p3 }
 0x4d7   : > { %789 = vrot.lane.b32.xlu0 %v1706_v19, %s1474_s24 }
 0x4f6   : > { %522 = vmax.xlane.f32.xlu0 %v521_v58 }
 0x546   : > { %v683_v59 = vpop.xlane.xlu0 %682 }
 0x547   : > { %v684_v60 = vsub.f32 %v675_v53, %v683_v59 }
 0x549   : > { %v685_v61 = vmul.f32 1.442695, %v684_v60  ;;  %v1069_v60 = vld [vmem:[%s1836_s3] ss:$0 sm:$0xff] }
 0x54a   : > { %v694_v62 = vpop.permute.xlu0 %693 }
 0x54b   : > { %1289 = vpow2.f32 %v685_v61  ;;  %v699_v63 = vsel %vm372_vm2, %v694_v62, 0 }
 0x54c   : > { %1161 = vmatpush3.bf16.msra.mxu0 %v699_v63 }
 0x54d   : > { %1172 = vmatprep.subr.bf16.mxu0 %v1464_v0 }
 0x54e   : > { %v792_v3 = vpop.permute.xlu0 %791 }
 0x54f   : > { %v797_v15 = vsel %vm308_vm3, %v792_v3, 0 }
 0x552   : > { %v790_v4 = vpop.permute.xlu0 %789 }
 0x555   : > { %v1290_v1 = vpop.eup %1289 }
 0x556   : > { %v687_v2 = vsel %vm308_vm3, %v1290_v1, 0.0 }
 0x557   : > { %688 = vadd.xlane.f32.xlu1 %v687_v2 }
 0x583   : > { %v523_v5 = vpop.xlane.xlu0 %522 }
 0x584   : > { %v524_v6 = vsub.f32 %v515_v49, %v523_v5 }
 0x586   : > { %v525_v7 = vmul.f32 1.442695, %v524_v6 }
 0x588   : > { %1291 = vpow2.f32 %v525_v7 }
 0x592   : > { %v1292_v8 = vpop.eup %1291 }
 0x593   : > { %v527_v9 = vsel %vm308_vm3, %v1292_v8, 0.0 }
 0x594   : > { %528 = vadd.xlane.f32.xlu1 %v527_v9 }
 0x5a5   : > { %533 = vrot.lane.b32.xlu1 %v1697_v10, %s1475_s20 }
 0x5e4   : > { %v689_v11 = vpop.xlane.xlu1 %688 }
 0x5e5   : > { %1293 = vrcp.f32 %v689_v11 }
 0x5ef   : > { %v1294_v12 = vpop.eup %1293 }
 0x5f0   : > { %v691_v13 = vmul.f32 %v1294_v12, %v1290_v1 }
 0x5f2   : > { %v692_v14 = vpack.c.bf16 %v691_v13, %v691_v13 }
 0x5f4   : > { %1163 = vmatmul.mubr.msk.bf16.vlgmr.msra.gmra.mrb[16].mxu0 %vm308_vm3, %v692_v14 }
 0x5f5   : > { %1173 = vmatpush3.bf16.xpose.msra.mxu0 %v797_v15  ;;  %1174 = vmatprep.mubr.msk.bf16.mxu0 %vm1465_vm0, %v1464_v0 }
 0x5fc   : > { %1175 = vmatmul.mubr.msk.bf16.vlgmr.msra.gmra.mrb[20].mxu0 %vm308_vm3, %v790_v4 }
 0x621   : > { %v529_v16 = vpop.xlane.xlu1 %528 }
 0x622   : > { %1295 = vrcp.f32 %v529_v16 }
 0x625   : > { %v534_v17 = vpop.permute.xlu1 %533 }
 0x626   : > { %v539_v18 = vsel %vm372_vm2, %v534_v17, 0 }
 0x627   : > { %1143 = vmatpush3.bf16.msra.mxu1 %v539_v18 }
 0x628   : > { %1148 = vmatprep.subr.bf16.mxu1 %v1464_v0 }
 0x62c   : > { %v1296_v19 = vpop.eup %1295 }
 0x62d   : > { %v531_v20 = vmul.f32 %v1296_v19, %v1292_v8 }
 0x62f   : > { %v532_v21 = vpack.c.bf16 %v531_v20, %v531_v20 }
 0x631   : > { %1145 = vmatmul.mubr.msk.bf16.vlgmr.msra.gmra.mrb[8].mxu1 %vm308_vm3, %v532_v21 }
 0x632   : > { %1150 = vmatprep.mubr.msk.bf16.mxu1 %vm1465_vm0, %v1464_v0  ;;  %1149 = vmatpush3.bf16.msra.mxu1 %v588_v23 }
 0x633   : > { %1166 = vmatprep.subr.bf16.mxu1 %v1464_v0 }
 0x6c7   : > { %v735_v24 = vpop.f32.mrb[16].mxu0 }
 0x6c8   : > { %v1164_v25 = vpop.f32.mrb[17].mxu0  ;;  %v741_v42 = vpack.c.bf16 %v735_v24, %v735_v24 }
 0x6c9   : > { %v738_v26 = vpop.f32.mrb[18].mxu0 }
 0x6ca   : > { %v1165_v27 = vpop.f32.mrb[19].mxu0 }
 0x6cf   : > { %v833_v28 = vpop.f32.mrb[20].mxu0 }
 0x6d0   : > { %v1176_v29 = vpop.f32.mrb[21].mxu0  ;;  %v839_v30 = vsel %vm308_vm3, %v833_v28, -inf }
 0x6d1   : > { %840 = vmax.xlane.f32.xlu1 %v839_v30  ;;  %v836_v31 = vpop.f32.mrb[22].mxu0 }
 0x6d2   : > { %v1177_v32 = vpop.f32.mrb[23].mxu0 }
 0x704   : > { %v575_v36 = vpop.f32.mrb[8].mxu1 }
 0x705   : > { %v581_v37 = vpack.c.bf16 %v575_v36, %v575_v36  ;;  %v1146_v38 = vpop.f32.mrb[9].mxu1 }
 0x706   : > { %v578_v40 = vpop.f32.mrb[10].mxu1 }
 0x707   : > { %v1147_v41 = vpop.f32.mrb[11].mxu1  ;;  %1151 = vmatmul.mubr.msk.bf16.vlgmr.msra.gmra.mrb[4].mxu1 %vm308_vm3, %v581_v37 }
 0x708   : > { %1167 = vmatpush3.bf16.msra.mxu1 %v746_v39  ;;  %1168 = vmatprep.mubr.msk.bf16.mxu1 %vm1465_vm0, %v1464_v0 }
 0x709   : > { %1178 = vmatprep.subr.bf16.mxu1 %v1464_v0 }
 0x713   : > { %1169 = vmatmul.mubr.msk.bf16.vlgmr.msra.gmra.mrb[4].mxu1 %vm308_vm3, %v741_v42 }
 0x714   : > { %1180 = vmatprep.mubr.msk.bf16.mxu1 %vm1465_vm0, %v1464_v0 }
 0x75e   : > { %v841_v43 = vpop.xlane.xlu1 %840 }
 0x75f   : > { %v842_v44 = vsub.f32 %v833_v28, %v841_v43 }
 0x761   : > { %v843_v45 = vmul.f32 1.442695, %v842_v44 }
 0x763   : > { %1297 = vpow2.f32 %v843_v45 }
 0x76d   : > { %v1298_v46 = vpop.eup %1297 }
 0x76e   : > { %v845_v47 = vsel %vm308_vm3, %v1298_v46, 0.0 }
 0x76f   : > { %846 = vadd.xlane.f32.xlu0 %v845_v47 }
 0x785   : > { %851 = vrot.lane.b32.xlu0 %v1697_v10, %s1476_s28 }
 0x7fc   : > { %v847_v48 = vpop.xlane.xlu0 %846 }
 0x7fd   : > { %1299 = vrcp.f32 %v847_v48 }
 0x800   : > { %v852_v49 = vpop.permute.xlu0 %851 }
 0x801   : > { %v857_v50 = vsel %vm372_vm2, %v852_v49, 0 }
 0x802   : > { %1179 = vmatpush3.bf16.msra.mxu1 %v857_v50 }
 0x803   : > { %1184 = vmatprep.subr.bf16.mxu1 %v1464_v0 }
 0x807   : > { %v1300_v52 = vpop.eup %1299 }
 0x808   : > { %v849_v53 = vmul.f32 %v1300_v52, %v1298_v46 }
 0x80a   : > { %v850_v54 = vpack.c.bf16 %v849_v53, %v849_v53 }
 0x80c   : > { %1181 = vmatmul.mubr.msk.bf16.vlgmr.msra.gmra.mrb[12].mxu1 %vm308_vm3, %v850_v54 }
 0x80d   : > { %1185 = vmatpush3.bf16.msra.mxu1 %v906_v55  ;;  %1186 = vmatprep.mubr.msk.bf16.mxu1 %vm1465_vm0, %v1464_v0 }
 0x8df   : > { %v893_v10 = vpop.f32.mrb[12].mxu1 }
 0x8e0   : > { %v899_v56 = vpack.c.bf16 %v893_v10, %v893_v10  ;;  %v1182_v57 = vpop.f32.mrb[13].mxu1 }
 0x8e1   : > { %v896_v58 = vpop.f32.mrb[14].mxu1 }
 0x8e2   : > { %v1183_v59 = vpop.f32.mrb[15].mxu1  ;;  %1187 = vmatmul.mubr.msk.bf16.vlgmr.msra.gmra.mrb[4].mxu1 %vm308_vm3, %v899_v56 }
 0x9b5   : > { %v942_v61 = vpop.f32.mrb[4].mxu1 }
 0x9b6   : > { %v1190_v62 = vadd.f32 %v1069_v60, %v942_v61  ;;  %v1188_v0 = vpop.f32.mrb[5].mxu1 }
 0x9b7   : > { %v945_v63 = vpop.f32.mrb[6].mxu1 }
 0x9b8   : > { %v1189_v1 = vpop.f32.mrb[7].mxu1  ;;  %949 = vst.msk [vmem:[%s241_s8] sm:$0xff] %vm257_vm1, %v1190_v62 }
 0x9b9   : > { %1400 = shalt.err (!%p1397_p2)
}
 0x9ba   : > { %s1401_s29 = scalar_lea.hbm %s1788_s30, 128  ;;  %s1405_s20 = scalar_lea.hbm %s1837_s4, 256 }
 0x9bb   : > { %p1402_p13 = scmp.ne.s32.totalorder %s1788_s30, %s1401_s29  ;;  %p1406_p4 = scmp.lt.u32.totalorder %s1788_s30, %s1837_s4 }
 0x9bc   : > { %p1407_p5 = scmp.lt.u32.totalorder %s1405_s20, %s1401_s29  ;;  %p1409_p11 = scmp.lt.u32.totalorder %s1401_s29, %s1788_s30 }
 0x9bd   : > { %p1403_p6 = pnand %p1402_p13, %p1851_p0 }
 0x9be   : > { %p1408_p8 = por %p1407_p5, %p1406_p4 }
 0x9bf   : > { %p1404_p10 = pneg %p1403_p6 }
 0x9c0   : > { %p1410_p1 = por %p1409_p11, %p1408_p8 }
 0x9c2   : > { %p1411_p3 = pnand %p1410_p1, %p1404_p10 }
 0x9c4   : > { %1414 = shalt.err (!%p1411_p3)
}
 0x9c5   : > { %1213 = dma.vmem_to_hbm [thread:$0]  (%p1851_p0), %s1790_s21, 128, %s1788_s30, %s951_s19  }
 0x9c6 PF: > { %s976_s12 = sand.u32 1, %s1445_s15   ;;  %p1852_p7 = scmp.ne.s32.totalorder %s1842_s22, 0 }
 0x9c7   : > { %p1853_p9 = scmp.ge.s32.totalorder %s1457_s18, 2  ;;  %s977_s7 = scalar_lea.sflag [#allocation4], %s976_s12 }
 0x9c9   : > { %p1227_p12 = pnand %p1853_p9, %p1852_p7 }
 0x9cb   : > { %1440 = dma.done.wait (!%p1227_p12), %s977_s7, 128  }
 0x9cc   : > { %1442 = vsyncadd (!%p1227_p12), %s977_s7, 4294967168  ;;  %p18_p2 = scmp.ge.s32.totalorder %s1613_s9, 4   ;;  %s1854_s15 = smov %s1449_s16 }
 0x9cd   : > { %s1855_s16 = smov %s1453_s17  ;;  %s1856_s17 = smov %s1629_s14 }
 0x9ce   : > { %s1857_s18 = smov %s1613_s9  ;;  %20 = sbr.rel (!%p18_p2) target bundleno = 6 (0x6), region = 89 }
 0x9d5   :  { %982 = vsyncpa [#allocation3], 1 }
 0x9d6   :  { %984 = vsyncpa [#allocation3 + $0x1], 1 }
 0x9d7   :  { %985 = vsyncpa [#allocation6], 1 }
 0x9d8   :  { %986 = vsyncpa [#allocation4], 1 }
 0x9d9   :  { %988 = vsyncpa [#allocation4 + $0x1], 1 }

</bundles_post_ra>
